<compile_context>
chip_gen: v5e
topology: v5e:2x2
jax: 0.10.0
libtpu: 0.0.40
codegen_flags: <defaults>
</compile_context>

<pallas_src>
import functools
import math

import jax
import jax.numpy as jnp
from jax.experimental import pallas as pl
from jax.experimental.pallas import tpu as pltpu


def _round_up(x, m):
    return ((x + m - 1) // m) * m


def _pick_tile(dim, target, unit):
    """Largest multiple of `unit` that divides `dim` and is <= max(target, unit)."""
    target = max(unit, min(target, dim))
    best = unit
    t = unit
    while t <= target:
        if dim % t == 0:
            best = t
        t += unit
    return best


def _pick_m_tile(m, target):
    """Balanced M tile (multiple of 8) so padding waste stays small."""
    m = max(int(m), 1)
    if _round_up(m, 8) <= target:
        return _round_up(m, 8)
    n_tiles = -(-m // target)                  # ceil(m / target)
    return _round_up(-(-m // n_tiles), 8)      # ceil(m / n_tiles), 8-aligned


def _default_vmem_limit_bytes():
    # ~48 MiB on 64-MiB-VMEM parts (v7x), ~96 MiB on 128-MiB parts (v5e/v6e).
    try:
        cap = pltpu.get_tpu_info().vmem_capacity_bytes
    except Exception:
        cap = 64 * 1024 * 1024
    return max(32 * 1024 * 1024, min(int(cap) * 3 // 4, 96 * 1024 * 1024))


# ---------------------------------------------------------------------------
# Kernels
# ---------------------------------------------------------------------------
def _fuse_weight_kernel(diff_idx_ref, wb_ref, wd_ref, o_ref):
    # fused = base + diff[idx]; add in f32 (v5e has no bf16 VALU), single
    # downcast to the output dtype (bf16 for the MXU path).
    del diff_idx_ref  # consumed by the index_maps (scalar prefetch)
    w = wb_ref[...].astype(jnp.float32) + wd_ref[...].astype(jnp.float32)
    o_ref[...] = w.astype(o_ref.dtype)


def _matmul_prefused_kernel(x_ref, w_ref, b_ref, o_ref, acc_ref, *,
                            compute_dtype):
    k = pl.program_id(2)

    @pl.when(k == 0)
    def _init():
        # Fold the fused bias into the accumulator init.
        b = b_ref[...].astype(jnp.float32)                       # [1, tn]
        acc_ref[...] = jnp.broadcast_to(b, acc_ref.shape)

    # Contract the shared `in` axis (last dim of both tiles): no transpose, so
    # Mosaic feeds the MXU directly.
    acc_ref[...] += jax.lax.dot_general(
        x_ref[...].astype(compute_dtype), w_ref[...].astype(compute_dtype),
        dimension_numbers=(((1,), (1,)), ((), ())),
        preferred_element_type=jnp.float32)

    @pl.when(k == pl.num_programs(2) - 1)
    def _finalize():
        o_ref[...] = acc_ref[...].astype(o_ref.dtype)


def _matmul_infuse_kernel(diff_idx_ref, x_ref, wb_ref, wd_ref, b_ref, o_ref,
                          acc_ref, *, compute_dtype):
    del diff_idx_ref  # consumed by the index_maps (scalar prefetch)
    k = pl.program_id(2)

    @pl.when(k == 0)
    def _init():
        b = b_ref[...].astype(jnp.float32)                       # [1, tn]
        acc_ref[...] = jnp.broadcast_to(b, acc_ref.shape)

    # base + diff in f32 (single rounding), downcast once for the MXU.
    w = (wb_ref[...].astype(jnp.float32)
         + wd_ref[...].astype(jnp.float32)).astype(compute_dtype)
    acc_ref[...] += jax.lax.dot_general(
        x_ref[...].astype(compute_dtype), w,
        dimension_numbers=(((1,), (1,)), ((), ())),
        preferred_element_type=jnp.float32)

    @pl.when(k == pl.num_programs(2) - 1)
    def _finalize():
        o_ref[...] = acc_ref[...].astype(o_ref.dtype)


# ---------------------------------------------------------------------------
# Wrapper
# ---------------------------------------------------------------------------
def diff_linear(x, base_weight, base_bias, diff_weights, diff_biases,
                diff_index, *, tm=512, tn=1024, tk=512,
                use_bf16_matmul=True, prefuse=None, vmem_limit_bytes=None):
    """x: [..., in_features] -> [..., out_features].

    Matches DiffLinear.forward(inputs, diff_index):
      out = x @ (base_weight + diff_weights[diff_index]).T
            + (base_bias + diff_biases[diff_index])
    """
    out_features, in_features = base_weight.shape

    lead_shape = x.shape[:-1]
    m = math.prod(lead_shape) if lead_shape else 1
    x2d = x.reshape(m, in_features)

    n_p = _round_up(out_features, 128)
    k_p = _round_up(in_features, 128)

    # Parameters: pass-through when already 128-aligned (the common case).
    if n_p == out_features and k_p == in_features:
        wb, wd = base_weight, diff_weights
    else:
        # Fallback only: for unaligned feature dims, pre-pad the parameters
        # ONCE at init time instead of paying this O(num_diffs*N*K) HBM copy
        # on every call.
        wb = jnp.pad(base_weight,
                     ((0, n_p - out_features), (0, k_p - in_features)))
        wd = jnp.pad(diff_weights,
                     ((0, 0), (0, n_p - out_features), (0, k_p - in_features)))

    # Fused bias on the wrapper side (O(N)); single operand in the kernel.
    if base_bias is None:
        bias_f = jnp.zeros((out_features,), dtype=x.dtype)
    else:
        bias_f = base_bias + diff_biases[diff_index]
    if n_p != out_features:
        bias_f = jnp.pad(bias_f, (0, n_p - out_features))
    bias_f = bias_f.reshape(1, n_p)

    # --- tile selection: exact divisors of the (aligned) dims ---------------
    n_t = _pick_tile(n_p, tn, 128)
    k_t = _pick_tile(k_p, tk, 128)
    m_t = _pick_m_tile(m, tm)
    m_p = _round_up(m, m_t)
    m_tiles = m_p // m_t
    # Megacore: with a single M tile, split N into >= 2 blocks so both
    # TensorCores (v7x) get work on the parallel axes.
    if m_tiles == 1 and n_p // n_t < 2 and n_p >= 256:
        n_t = _pick_tile(n_p, n_p // 2, 128)
    n_tiles = n_p // n_t
    k_tiles = k_p // k_t

    x_p = x2d
    if m_p != m or k_p != in_features:
        x_p = jnp.pad(x2d, ((0, m_p - m), (0, k_p - in_features)))

    compute_dtype = jnp.bfloat16 if use_bf16_matmul else jnp.float32
    if vmem_limit_bytes is None:
        vmem_limit_bytes = _default_vmem_limit_bytes()
    if prefuse is None:
        # Pre-fusing the weight pays off once it is re-streamed for >= ~3 M tiles.
        prefuse = m_tiles >= 3

    diff_idx = jnp.asarray(diff_index, dtype=jnp.int32).reshape((1,))
    itemsize = jnp.dtype(x.dtype).itemsize

    mm_params = pltpu.CompilerParams(
        dimension_semantics=("parallel", "parallel", "arbitrary"),
        vmem_limit_bytes=vmem_limit_bytes)

    if prefuse:
        # ---- Pass 1: fuse base + diff[idx] once (bf16 output for the MXU path).
        fused_dtype = compute_dtype if use_bf16_matmul else base_weight.dtype
        w_fused = pl.pallas_call(
            _fuse_weight_kernel,
            out_shape=jax.ShapeDtypeStruct((n_p, k_p), fused_dtype),
            grid_spec=pltpu.PrefetchScalarGridSpec(
                num_scalar_prefetch=1,
                grid=(n_tiles, k_tiles),
                in_specs=[
                    pl.BlockSpec((n_t, k_t), lambda j, k, idx: (j, k)),
                    pl.BlockSpec((None, n_t, k_t),
                                 lambda j, k, idx: (idx[0], j, k)),
                ],
                out_specs=pl.BlockSpec((n_t, k_t), lambda j, k, idx: (j, k)),
            ),
            compiler_params=pltpu.CompilerParams(
                dimension_semantics=("parallel", "parallel"),
                vmem_limit_bytes=vmem_limit_bytes),
        )(diff_idx, wb, wd)

        cost = pl.CostEstimate(
            flops=2 * m_p * n_p * k_p, transcendentals=0,
            bytes_accessed=(m_p * k_p + m_p * n_p) * itemsize
            + m_tiles * n_p * k_p * jnp.dtype(fused_dtype).itemsize)

        # ---- Pass 2: matmul streaming a single fused weight operand.
        out_p = pl.pallas_call(
            functools.partial(_matmul_prefused_kernel,
                              compute_dtype=compute_dtype),
            out_shape=jax.ShapeDtypeStruct((m_p, n_p), x.dtype),
            grid_spec=pltpu.PrefetchScalarGridSpec(
                num_scalar_prefetch=0,
                grid=(m_tiles, n_tiles, k_tiles),
                in_specs=[
                    pl.BlockSpec((m_t, k_t), lambda i, j, k: (i, k)),
                    # NOTE: if profiling shows exposed DMA in the k loop (v5e,
                    # small tm), add pipeline_mode=pl.Buffered(3) to this spec.
                    pl.BlockSpec((n_t, k_t), lambda i, j, k: (j, k)),
                    pl.BlockSpec((1, n_t), lambda i, j, k: (0, j)),
                ],
                out_specs=pl.BlockSpec((m_t, n_t), lambda i, j, k: (i, j)),
                scratch_shapes=[pltpu.VMEM((m_t, n_t), jnp.float32)],
            ),
            compiler_params=mm_params,
            cost_estimate=cost,
        )(x_p, w_fused, bias_f)
    else:
        wbytes = jnp.dtype(base_weight.dtype).itemsize
        cost = pl.CostEstimate(
            flops=2 * m_p * n_p * k_p, transcendentals=0,
            bytes_accessed=(m_p * k_p + m_p * n_p) * itemsize
            + m_tiles * 2 * n_p * k_p * wbytes)

        # ---- Single pass: in-kernel weight fusion (small-M / decode shapes).
        out_p = pl.pallas_call(
            functools.partial(_matmul_infuse_kernel,
                              compute_dtype=compute_dtype),
            out_shape=jax.ShapeDtypeStruct((m_p, n_p), x.dtype),
            grid_spec=pltpu.PrefetchScalarGridSpec(
                num_scalar_prefetch=1,
                grid=(m_tiles, n_tiles, k_tiles),
                in_specs=[
                    pl.BlockSpec((m_t, k_t), lambda i, j, k, idx: (i, k)),
                    pl.BlockSpec((n_t, k_t), lambda i, j, k, idx: (j, k)),
                    pl.BlockSpec((None, n_t, k_t),
                                 lambda i, j, k, idx: (idx[0], j, k)),
                    pl.BlockSpec((1, n_t), lambda i, j, k, idx: (0, j)),
                ],
                out_specs=pl.BlockSpec((m_t, n_t),
                                       lambda i, j, k, idx: (i, j)),
                scratch_shapes=[pltpu.VMEM((m_t, n_t), jnp.float32)],
            ),
            compiler_params=mm_params,
            cost_estimate=cost,
        )(diff_idx, x_p, wb, wd, bias_f)

    out2d = out_p[:m, :out_features]
    return out2d.reshape(*lead_shape, out_features)


def init_diff_linear_params(key, in_features, out_features, num_diffs,
                            dtype=jnp.float32):
    """Deterministic synthetic init mirroring the PyTorch module's shapes."""
    keys = jax.random.split(key, 2 + 2 * num_diffs)
    xavier_std = (2.0 / (in_features + out_features)) ** 0.5

    base_weight = xavier_std * jax.random.normal(
        keys[0], (out_features, in_features), dtype)
    base_bias = jax.random.normal(keys[1], (out_features,), dtype)

    diff_weights = jnp.stack(
        [xavier_std * jax.random.normal(
            keys[2 + 2 * i], (out_features, in_features), dtype)
         for i in range(num_diffs)], axis=0)
    diff_biases = jnp.stack(
        [jax.random.normal(keys[3 + 2 * i], (out_features,), dtype)
         for i in range(num_diffs)], axis=0)

    return base_weight, base_bias, diff_weights, diff_biases


if __name__ == "__main__":
    key = jax.random.PRNGKey(0)
    k_x, k_p = jax.random.split(key)

    batch, seq = 2, 8
    in_features, out_features, num_diffs = 256, 384, 2
    x = jax.random.normal(k_x, (batch, seq, in_features), jnp.float32)

    base_w, base_b, diff_ws, diff_bs = init_diff_linear_params(
        k_p, in_features, out_features, num_diffs)

    # Pure-JAX reference of the PyTorch forward semantics.
    def reference(di):
        w_ref = base_w + diff_ws[di]
        b_ref = base_b + diff_bs[di]
        return x @ w_ref.T + b_ref

    # 1) Default config: bf16 MXU feed, auto path (in-kernel fusion for small M),
    #    N split into multiple tiles for megacore.
    for di in range(num_diffs):
        out = jax.block_until_ready(
            diff_linear(x, base_w, base_b, diff_ws, diff_bs, di))
        assert out.shape == (batch, seq, out_features)
        assert jnp.allclose(out, reference(di), atol=5e-2, rtol=5e-2)

    # 2) Exact f32 path with small tiles -> multi-step (M, N, K) grid exercising
    #    the accumulator init / finalize across the reduction axis.
    out = jax.block_until_ready(
        diff_linear(x, base_w, base_b, diff_ws, diff_bs, 1,
                    tm=8, tn=128, tk=128, use_bf16_matmul=False))
    assert jnp.allclose(out, reference(1), atol=1e-4, rtol=1e-4)

    # 3) Pre-fused-weight path (fusion kernel + single-weight matmul), f32 exact.
    out = jax.block_until_ready(
        diff_linear(x, base_w, base_b, diff_ws, diff_bs, 0,
                    tm=8, tn=128, tk=128, use_bf16_matmul=False, prefuse=True))
    assert jnp.allclose(out, reference(0), atol=1e-4, rtol=1e-4)

    print("KERNEL_OK")
</pallas_src>

<mosaic_0001>
module attributes {stable_mosaic.version = 11 : i64} {
  func.func @_matmul_infuse_kernel(%arg0: i32, %arg1: i32, %arg2: i32, %arg3: memref<1xi32, #tpu.memory_space<smem>>, %arg4: memref<16x256xf32, #tpu.memory_space<vmem>>, %arg5: memref<128x256xf32, #tpu.memory_space<vmem>>, %arg6: memref<1x128x256xf32, #tpu.memory_space<vmem>>, %arg7: memref<1x128xf32, #tpu.memory_space<vmem>>, %arg8: memref<16x128xf32, #tpu.memory_space<vmem>>, %arg9: memref<16x128xf32, #tpu.memory_space<vmem>>) attributes {dimension_semantics = [#tpu.dimension_semantics<parallel>, #tpu.dimension_semantics<parallel>, #tpu.dimension_semantics<arbitrary>], iteration_bounds = array<i64: 1, 3, 1>, scalar_prefetch = 1 : i64, scratch_operands = 1 : i64, tpu.core_type = #tpu.core_type<tc>, window_params = [{transform_indices = @transform_0, window_bounds = array<i64: 16, 256>}, {transform_indices = @transform_1, window_bounds = array<i64: 128, 256>}, {transform_indices = @transform_2, window_bounds = array<i64: 1, 128, 256>}, {transform_indices = @transform_3, window_bounds = array<i64: 1, 128>}, {transform_indices = @transform_4, window_bounds = array<i64: 16, 128>}]} {
    %c0_i32 = arith.constant 0 : i32
    %0 = arith.cmpi eq, %arg2, %c0_i32 : i32
    %1 = arith.extui %0 : i1 to i32
    %c0_i32_0 = arith.constant 0 : i32
    %2 = arith.cmpi ne, %1, %c0_i32_0 : i32
    scf.if %2 {
      %c0_13 = arith.constant 0 : index
      %c0_14 = arith.constant 0 : index
      %17 = vector.load %arg7[%c0_13, %c0_14] : memref<1x128xf32, #tpu.memory_space<vmem>>, vector<1x128xf32>
      %18 = vector.shape_cast %17 : vector<1x128xf32> to vector<1x128xf32>
      %19 = vector.broadcast %18 : vector<1x128xf32> to vector<16x128xf32>
      %c0_15 = arith.constant 0 : index
      %c0_16 = arith.constant 0 : index
      %20 = vector.load %arg9[%c0_15, %c0_16] : memref<16x128xf32, #tpu.memory_space<vmem>>, vector<16x128xf32>
      tpu.vector_store %arg9[%c0_15, %c0_16], %19 {strides = array<i32>} : memref<16x128xf32, #tpu.memory_space<vmem>>, vector<16x128xf32>,
    } else {
    }
    %c0 = arith.constant 0 : index
    %c0_1 = arith.constant 0 : index
    %3 = vector.load %arg5[%c0, %c0_1] : memref<128x256xf32, #tpu.memory_space<vmem>>, vector<128x256xf32>
    %c0_2 = arith.constant 0 : index
    %c0_3 = arith.constant 0 : index
    %c0_4 = arith.constant 0 : index
    %4 = vector.load %arg6[%c0_2, %c0_3, %c0_4] : memref<1x128x256xf32, #tpu.memory_space<vmem>>, vector<1x128x256xf32>
    %5 = vector.shape_cast %4 : vector<1x128x256xf32> to vector<128x256xf32>
    %6 = arith.addf %3, %5 : vector<128x256xf32>
    %7 = arith.truncf %6 : vector<128x256xf32> to vector<128x256xbf16>
    %c0_5 = arith.constant 0 : index
    %c0_6 = arith.constant 0 : index
    %8 = vector.load %arg9[%c0_5, %c0_6] : memref<16x128xf32, #tpu.memory_space<vmem>>, vector<16x128xf32>
    %c0_7 = arith.constant 0 : index
    %c0_8 = arith.constant 0 : index
    %9 = vector.load %arg4[%c0_7, %c0_8] : memref<16x256xf32, #tpu.memory_space<vmem>>, vector<16x256xf32>
    %10 = arith.truncf %9 : vector<16x256xf32> to vector<16x256xbf16>
    %cst = arith.constant dense<0.000000e+00> : vector<16x128xf32>
    %11 = tpu.matmul %10, %7, %cst {dimension_numbers = #tpu.dot_dimension_numbers<[1], [1], [0], [0], [0, 0, 1, 0], [], []>} : vector<16x256xbf16>, vector<128x256xbf16>, vector<16x128xf32> -> vector<16x128xf32>
    %12 = arith.addf %8, %11 : vector<16x128xf32>
    %c0_9 = arith.constant 0 : index
    %c0_10 = arith.constant 0 : index
    %13 = vector.load %arg9[%c0_9, %c0_10] : memref<16x128xf32, #tpu.memory_space<vmem>>, vector<16x128xf32>
    tpu.vector_store %arg9[%c0_9, %c0_10], %12 {strides = array<i32>} : memref<16x128xf32, #tpu.memory_space<vmem>>, vector<16x128xf32>,
    %c0_i32_11 = arith.constant 0 : i32
    %14 = arith.cmpi eq, %arg2, %c0_i32_11 : i32
    %15 = arith.extui %14 : i1 to i32
    %c0_i32_12 = arith.constant 0 : i32
    %16 = arith.cmpi ne, %15, %c0_i32_12 : i32
    scf.if %16 {
      %c0_13 = arith.constant 0 : index
      %c0_14 = arith.constant 0 : index
      %17 = vector.load %arg9[%c0_13, %c0_14] : memref<16x128xf32, #tpu.memory_space<vmem>>, vector<16x128xf32>
      %c0_15 = arith.constant 0 : index
      %c0_16 = arith.constant 0 : index
      %18 = vector.load %arg8[%c0_15, %c0_16] : memref<16x128xf32, #tpu.memory_space<vmem>>, vector<16x128xf32>
      tpu.vector_store %arg8[%c0_15, %c0_16], %17 {strides = array<i32>} : memref<16x128xf32, #tpu.memory_space<vmem>>, vector<16x128xf32>,
    } else {
    }
    return
  }
  func.func @transform_0(%arg0: i32, %arg1: i32, %arg2: i32, %arg3: memref<1xi32, #tpu.memory_space<smem>>) -> (i32, i32) {
    %c0_i32 = arith.constant 0 : i32
    return %arg0, %arg2 : i32, i32
  }
  func.func @transform_1(%arg0: i32, %arg1: i32, %arg2: i32, %arg3: memref<1xi32, #tpu.memory_space<smem>>) -> (i32, i32) {
    %c0_i32 = arith.constant 0 : i32
    return %arg1, %arg2 : i32, i32
  }
  func.func @transform_2(%arg0: i32, %arg1: i32, %arg2: i32, %arg3: memref<1xi32, #tpu.memory_space<smem>>) -> (i32, i32, i32) {
    %c0 = arith.constant 0 : index
    %0 = memref.load %arg3[%c0] : memref<1xi32, #tpu.memory_space<smem>>
    %c0_i32 = arith.constant 0 : i32
    return %0, %arg1, %arg2 : i32, i32, i32
  }
  func.func @transform_3(%arg0: i32, %arg1: i32, %arg2: i32, %arg3: memref<1xi32, #tpu.memory_space<smem>>) -> (i32, i32) {
    %c0_i32 = arith.constant 0 : i32
    %c0_i32_0 = arith.constant 0 : i32
    return %c0_i32, %arg1 : i32, i32
  }
  func.func @transform_4(%arg0: i32, %arg1: i32, %arg2: i32, %arg3: memref<1xi32, #tpu.memory_space<smem>>) -> (i32, i32) {
    %c0_i32 = arith.constant 0 : i32
    return %arg0, %arg1 : i32, i32
  }
}

</mosaic_0001>

<bundles_post_ra>
// kernel: tpu_custom_call.1
= control target key start
LH: loop header
LB: loop body
LE: loop exit
PB: predicated region body
PF: predicated region fallthrough
CT: control target
= control target key end

     0   :  { %s1377_s0 = inlined_call_operand.<no memory space> [shape: s32[1], index: 0, kind: input, shape index: {}]   ;;  %s1378_s1 = inlined_call_operand.hbm [shape: f32[16,256], index: 1, kind: input, shape index: {}]   ;;  %s1379_s2 = inlined_call_operand.hbm [shape: f32[384,256], index: 2, kind: input, shape index: {}]   ;;  %s1380_s3 = inlined_call_operand.hbm [shape: f32[2,384,256], index: 3, kind: input, shape index: {}]   ;;  %s1381_s4 = inlined_call_operand.vmem [shape: f32[1,384], index: 4, kind: input, shape index: {}]   ;;  %s1382_s5 = inlined_call_operand.hbm [shape: f32[16,384], index: 5, kind: output, shape index: {}]  }
   0x1   :  { %1390 = sst [smem:[#allocation22_spill]] %s1378_s1 }
   0x2   :  { %1391 = sst [smem:[#allocation23_spill]] %s1379_s2 }
   0x3   :  { %10 = sst [smem:[#allocation4]] %s1377_s0 }
   0x4   :  { %11 = vsyncpa [#allocation6], 0 }
   0x5   :  { %12 = vsyncpa [#allocation9], 0 }
   0x6   :  { %14 = vsyncpa [#allocation9 + $0x1], 0 }
   0x7   :  { %15 = vsyncpa [#allocation7], 0 }
   0x8   :  { %17 = vsyncpa [#allocation7 + $0x1], 0  ;;  %s1055_s20 = smov 0   ;;  %s1057_s21 = smov 0  }
   0x9   :  { %s1059_s22 = smov 0   ;;  %s1061_s23 = smov 0  }
   0xa   :  { %s1063_s24 = smov 0   ;;  %s1065_s25 = smov 0  }
   0xb   :  { %s1067_s26 = smov 0   ;;  %s1069_s0 = smov 0  }
   0xc   :  { %s1071_s27 = smov 0  }
   0xd LB: > { %1392 = sst [smem:[#allocation16_spill]] %s994_s23  ;;  %s677_s28 = sadd.s32 4294967294, %s1014_s27   ;;  %s1014_s27 = sphi %s1071_s27, %s23_s27   ;;  %s1010_s0 = sphi %s1069_s0, %s1423_s0   ;;  %s1006_s26 = sphi %s1067_s26, %s1422_s26   ;;  %s1002_s25 = sphi %s1065_s25, %s1415_s25   ;;  %s998_s24 = sphi %s1063_s24, %s1421_s24   ;;  %s994_s23 = sphi %s1061_s23, %s1420_s23   ;;  %s990_s22 = sphi %s1059_s22, %s1419_s22   ;;  %s986_s21 = sphi %s1057_s21, %s1418_s21   ;;  %s982_s20 = sphi %s1055_s20, %s1417_s20  }
   0xe   : > { %1393 = sst [smem:[#allocation17_spill]] %s1002_s25  ;;  %s38_s29 = sadd.s32 1, %s1010_s0 }
   0xf   : > { %p40_p0 = scmp.ge.s32.totalorder %s38_s29, 3  ;;  %s79_s30 = sadd.s32 1, %s1002_s25 }
  0x10   : > { %p86_p1 = scmp.ne.s32.totalorder %s1002_s25, %s998_s24  ;;  %p87_p2 = scmp.eq.s32.totalorder %s1014_s27, 0 }
  0x11   : > { %s1425_s29 = smov (%p40_p0, %s38_s29), 0  ;;  %p92_p4 = scmp.ne.s32.totalorder %s998_s24, %s994_s23 }
  0x12   : > { %1394 = sst [smem:[#allocation18_spill]] %s1425_s29  ;;  %p1113_p3 = por %p87_p2, %p86_p1 }
  0x13   : > { %s74_s7 = ssub.s32 %s1010_s0, %s1425_s29  ;;  %s1121_s8 = sld [smem:[#allocation4]] }
  0x14   : > { %p1123_p5 = scmp.eq.s32.totalorder %s74_s7, 0  ;;  %p182_p6 = scmp.eq.s32.totalorder %s677_s28, 2 }
  0x15   : > { %p728_p8 = scmp.lt.s32.totalorder %s1014_s27, 3  ;;  %s222_s12 = sand.u32 1, %s1014_s27  }
  0x16   : > { %s1130_s10 = scalar_select %p1123_p5, %s1002_s25, %s79_s30  }
  0x17   : > { %p1135_p7 = por %p182_p6, %p92_p4  ;;  %s224_s13 = sand.u32 1, %s1002_s25  }
  0x18   : > { %1397 = sst [smem:[#allocation19_spill]] %s1130_s10  ;;  %s681_s14 = sshll.u32 %s224_s13, 8 }
  0x19   : > { %s1398_s11 = scalar_select %p1135_p7, 1, 0 }
  0x1a   : > { %s699_s15 = sshll.u32 %s1010_s0, 8  ;;  %s1400_s2 = sld [smem:[#allocation23_spill]] }
  0x1b   : > { %1399 = sst [smem:[#allocation20_spill]] %s1398_s11  ;;  %s226_s19 = scalar_lea.vmem [#allocation8], %s681_s14 }
  0x1c   : > { %s237_s28 = sshll.u32 %s226_s19, 4  ;;  %p717_p9 = pnand %p728_p8, %p1113_p3  ;;  %s238_s28 = int_to_ptr.vmem [resolvable:$true] %s237_s28 }
  0x1d   : > { %s1150_s7 = scalar_lea.sflag [#allocation9], %s222_s12  ;;  %s1383_s13 = smov 256  }
  0x1e   : > { %s1017_s16 = smov 16   ;;  %s1157_s14 = sadd.s32 4294967295, %s1014_s27  }
  0x1f   : > { %p1389_p10 = scmp.eq.s32.totalorder %s1157_s14, 0  ;;  %p124_p11 = scmp.ne.s32.totalorder %s986_s21, %s982_s20 }
  0x20   : > { %s234_s18 = scalar_lea.hbm %s1400_s2, %s699_s15  ;;  %p176_p12 = scmp.eq.s32.totalorder %s1157_s14, 2 }
  0x21   : > { %s235_s30 = sshll.u32 %s234_s18, 4  ;;  %p678_p13 = scmp.ge.s32.totalorder %s1014_s27, 1  ;;  %s236_s30 = int_to_ptr.hbm [resolvable:$true] %s235_s30 }
  0x22   : > { %719 = dma.hbm_to_vmem [thread:$0]  (!%p717_p9), %s236_s30, 4096, %s238_s28, %s1150_s7, %s1383_s13, %s1383_s13, %s1017_s16  }
  0x23   : > { %p1169_p0 = por %p1389_p10, %p92_p4  ;;  %p1175_p3 = por %p124_p11, %p1389_p10 }
  0x24   : > { %p1182_p6 = por %p176_p12, %p86_p1  ;;  %p189_p9 = scmp.lt.s32.totalorder %s1014_s27, 4 }
  0x25   : > { %s1404_s1 = sld [smem:[#allocation22_spill]]  ;;  %s1018_s28 = smov [#allocation5]  }
  0x26   : > { %p1190_p4 = pnand %p678_p13, %p189_p9  ;;  %s208_s30 = sshll.u32 %s1018_s28, 4  ;;  %s209_s30 = int_to_ptr.vmem [resolvable:$true] %s208_s30 }
  0x27   : > { %s111_s13 = sadd.s32 1, %s990_s22  ;;  %p118_p12 = scmp.ne.s32.totalorder %s990_s22, %s986_s21 }
  0x28   : > { %p712_p11 = pneg %p1190_p4  ;;  %s1407_s17 = smov 256  }
  0x29   : > { %s1202_s15 = scalar_select %p1123_p5, %s990_s22, %s111_s13  }
  0x2a   : > { %p713_p1 = pnand %p712_p11, %p1389_p10  ;;  %p120_p13 = por %p118_p12, %p87_p2 }
  0x2b   : > { %s206_s18 = sshll.u32 %s1404_s1, 4  ;;  %1406 = sst [smem:[#allocation21_spill]] %s1202_s15  ;;  %s207_s18 = int_to_ptr.hbm [resolvable:$true] %s206_s18 }
  0x2c   : > { %715 = dma.hbm_to_vmem [thread:$0]  (!%p713_p1), %s207_s18, 512, %s209_s30, [#allocation6], %s1407_s17, %s1407_s17, %s1017_s16  }
  0x2d   : > { %s249_s1 = sand.u32 1, %s990_s22   ;;  %s700_s29 = sshll.u32 %s1010_s0, 5 }
  0x2e   : > { %s685_s2 = sshll.u32 %s249_s1, 8  ;;  %s701_s10 = smul.u32 96, %s1121_s8 }
  0x2f   : > { %s251_s25 = scalar_lea.vmem [#allocation10], %s685_s2  ;;  %p1216_p9 = pnand %p728_p8, %p120_p13 }
  0x30   : > { %s265_s28 = sshll.u32 %s251_s25, 4  ;;  %s260_s9 = sadd.s32 %s701_s10, %s700_s29  ;;  %s266_s28 = int_to_ptr.vmem [resolvable:$true] %s265_s28 }
  0x31   : > { %s688_s13 = sshll.u32 %s260_s9, 3  ;;  %p874_p5 = pneg %p1216_p9 }
  0x32   : > { %s262_s18 = scalar_lea.hbm %s1380_s3, %s688_s13  ;;  %s877_s29 = scalar_lea.hbm %s1380_s3, 1536 }
  0x33   : > { %s263_s30 = sshll.u32 %s262_s18, 4  ;;  %s264_s30 = int_to_ptr.hbm [resolvable:$true] %s263_s30 }
  0x34   : > { %s870_s1 = sshra.s32 %s264_s30, 4  ;;  %s871_s1 = int_to_ptr.hbm [resolvable:$true] %s870_s1 }
  0x35   : > { %s872_s8 = scalar_lea.hbm %s871_s1, 256  ;;  %p878_p1 = scmp.lt.s32.totalorder %s871_s1, %s1380_s3 }
  0x36   : > { %p873_p2 = scmp.ne.s32.totalorder %s871_s1, %s872_s8  ;;  %p879_p12 = scmp.lt.s32.totalorder %s877_s29, %s872_s8 }
  0x38   : > { %p875_p8 = pnand %p874_p5, %p873_p2  ;;  %p880_p13 = por %p879_p12, %p878_p1 }
  0x3a   : > { %p876_p11 = pneg %p875_p8 }
  0x3c   : > { %p881_p10 = pnand %p880_p13, %p876_p11 }
  0x3e   : > { %884 = shalt.err (!%p881_p10)
}
  0x3f   : > { %722 = dma.hbm_to_vmem [thread:$0]  (!%p1216_p9), %s264_s30, 4096, %s266_s28, %s1150_s7, %s1407_s17, %s1407_s17, %s1017_s16  }
  0x40   : > { %283 = sbr.rel (%p1190_p4) target bundleno = 292 (0x124), region = 36  ;;  %p1409_p2 = scmp.eq.s32.totalorder (!%p1190_p4), %s1157_s14, 0 }
  0x45   : > { %965 = dma.done.wait (%p1409_p2), [#allocation6], 512   ;;  %p1410_p5 = pmov %p1409_p2 }
  0x46   : > { %s290_s23 = sand.u32 1, %s1157_s14   ;;  %s1245_s15 = sand.u32 1, %s998_s24  }
  0x47   : > { %967 = vsyncadd (%p1410_p5), [#allocation6], 4294966784  ;;  %s691_s11 = sshll.u32 %s1245_s15, 8  ;;  %s291_s13 = scalar_lea.sflag [#allocation9], %s290_s23 }
  0x48   : > { %s1248_s18 = scalar_lea.vmem [#allocation8], %s691_s11 }
  0x49   : > { %969 = dma.done.wait (%p1169_p0), %s291_s13, 4096  }
  0x4a   : > { %971 = vsyncadd (%p1169_p0), %s291_s13, 4294963200  ;;  %s302_s7 = sand.u32 1, %s986_s21  }
  0x4b   : > { %s692_s16 = sshll.u32 %s302_s7, 8 }
  0x4c   : > { %s1255_s19 = scalar_lea.vmem [#allocation10], %s692_s16 }
  0x4d   : > { %973 = dma.done.wait (%p1175_p3), %s291_s13, 4096  }
  0x4e   : > { %975 = vsyncadd (%p1175_p3), %s291_s13, 4294963200  ;;  %v387_v0 = vld [vmem:[%s1248_s18 + $0xe0] sm:$0xff]  ;;  %v389_v1 = vld [vmem:[%s1248_s18 + $0xf0] sm:$0xff]  ;;  %p345_p10 = scmp.lt.s32.totalorder %s1006_s26, 2  ;;  %s693_s28 = sshll.u32 %s1245_s15, 4 }
  0x4f   : > { %v419_v2 = vld [vmem:[%s1255_s19 + $0xe0] sm:$0xff]  ;;  %v421_v3 = vld [vmem:[%s1255_s19 + $0xf0] sm:$0xff]  ;;  %v388_v5 = vld [vmem:[%s1248_s18 + $0xe8] sm:$0xff]  ;;  %s695_s30 = sshll.u32 %s1006_s26, 3  ;;  %s337_s25 = scalar_lea.vmem [#allocation11], %s693_s28 }
  0x50   : > { %v451_v4 = vadd.f32 %v419_v2, %v387_v0  ;;  %v390_v6 = vld [vmem:[%s1248_s18 + $0xf8] sm:$0xff]  ;;  %v453_v7 = vadd.f32 %v421_v3, %v389_v1  ;;  %v420_v8 = vld [vmem:[%s1255_s19 + $0xe8] sm:$0xff]  ;;  %v383_v10 = vld [vmem:[%s1248_s18 + $0xc0] sm:$0xff]  ;;  %s346_s14 = scalar_select %p345_p10, %s1006_s26, 2 }
  0x51   : > { %v422_v9 = vld [vmem:[%s1255_s19 + $0xf8] sm:$0xff]  ;;  %v452_v11 = vadd.f32 %v420_v8, %v388_v5  ;;  %v385_v13 = vld [vmem:[%s1248_s18 + $0xd0] sm:$0xff]  ;;  %v415_v14 = vld [vmem:[%s1255_s19 + $0xc0] sm:$0xff]  ;;  %s532_s2 = scalar_lea.hbm %s1382_s5, %s695_s30  ;;  %s533_s29 = sshll.u32 %s337_s25, 4  ;;  %s534_s29 = int_to_ptr.vmem [resolvable:$true] %s533_s29 }
  0x52   : > { %v454_v12 = vadd.f32 %v422_v9, %v390_v6  ;;  %v417_v15 = vld [vmem:[%s1255_s19 + $0xd0] sm:$0xff]  ;;  %v469_v16 = vpack.c.bf16 %v453_v7, %v451_v4  ;;  %v384_v17 = vld [vmem:[%s1248_s18 + $0xc8] sm:$0xff]  ;;  %v386_v18 = vld [vmem:[%s1248_s18 + $0xd8] sm:$0xff]  ;;  %v447_v22 = vadd.f32 %v415_v14, %v383_v10  ;;  %s347_s17 = scalar_lea.vmem %s1381_s4, %s346_s14  ;;  %s535_s10 = sshll.u32 %s532_s2, 4  ;;  %s536_s10 = int_to_ptr.hbm [resolvable:$true] %s535_s10 }
  0x53   : > { %v416_v19 = vld [vmem:[%s1255_s19 + $0xc8] sm:$0xff]  ;;  %v418_v21 = vld [vmem:[%s1255_s19 + $0xd8] sm:$0xff]  ;;  %v449_v23 = vadd.f32 %v417_v15, %v385_v13  ;;  %v379_v27 = vld [vmem:[%s1248_s18 + $0xa0] sm:$0xff]  ;;  %s519_s9 = scalar_lea.sflag [#allocation7], %s1245_s15  ;;  %s914_s23 = sshra.s32 %s536_s10, 4  ;;  %s915_s23 = int_to_ptr.hbm [resolvable:$true] %s914_s23 }
  0x54   : > { %v470_v20 = vpack.c.bf16 %v454_v12, %v452_v11  ;;  %479 = vmatpush.bf16.xpose.msra.mxu0 %v469_v16  ;;  %v448_v24 = vadd.f32 %v416_v19, %v384_v17  ;;  %v450_v25 = vadd.f32 %v418_v21, %v386_v18  ;;  %v381_v28 = vld [vmem:[%s1248_s18 + $0xb0] sm:$0xff]  ;;  %v411_v30 = vld [vmem:[%s1255_s19 + $0xa0] sm:$0xff]  ;;  %v380_v32 = vld [vmem:[%s1248_s18 + $0xa8] sm:$0xff]  ;;  %s916_s26 = scalar_lea.hbm %s915_s23, 16  ;;  %p921_p9 = scmp.lt.s32.totalorder %s915_s23, %s1382_s5 }
  0x55   : > { %v467_v26 = vpack.c.bf16 %v449_v23, %v447_v22  ;;  %v413_v31 = vld [vmem:[%s1255_s19 + $0xb0] sm:$0xff]  ;;  %v382_v33 = vld [vmem:[%s1248_s18 + $0xb8] sm:$0xff]  ;;  %v412_v34 = vld [vmem:[%s1255_s19 + $0xa8] sm:$0xff]  ;;  %v443_v36 = vadd.f32 %v411_v30, %v379_v27  ;;  %p917_p0 = scmp.ne.s32.totalorder %s915_s23, %s916_s26 }
  0x56   : > { %493 = vmatpush.bf16.xpose.msra.mxu1 %v470_v20  ;;  %v468_v29 = vpack.c.bf16 %v450_v25, %v448_v24  ;;  %v414_v35 = vld [vmem:[%s1255_s19 + $0xb8] sm:$0xff]  ;;  %v445_v37 = vadd.f32 %v413_v31, %v381_v28  ;;  %v444_v38 = vadd.f32 %v412_v34, %v380_v32  ;;  %v375_v41 = vld [vmem:[%s1248_s18 + $0x80] sm:$0xff]  ;;  %v377_v42 = vld [vmem:[%s1248_s18 + $0x90] sm:$0xff] }
  0x57   : > { %v446_v39 = vadd.f32 %v414_v35, %v382_v33  ;;  %v407_v44 = vld [vmem:[%s1255_s19 + $0x80] sm:$0xff]  ;;  %v409_v45 = vld [vmem:[%s1255_s19 + $0x90] sm:$0xff]  ;;  %v376_v46 = vld [vmem:[%s1248_s18 + $0x88] sm:$0xff]  ;;  %p918_p3 = pnand %p917_p0, %p1182_p6 }
  0x58   : > { %v465_v40 = vpack.c.bf16 %v445_v37, %v443_v36  ;;  %v378_v47 = vld [vmem:[%s1248_s18 + $0x98] sm:$0xff]  ;;  %v408_v48 = vld [vmem:[%s1255_s19 + $0x88] sm:$0xff]  ;;  %v439_v50 = vadd.f32 %v407_v44, %v375_v41  ;;  %v441_v51 = vadd.f32 %v409_v45, %v377_v42  ;;  %v371_v55 = vld [vmem:[%s1248_s18 + $0x60] sm:$0xff] }
  0x59   : > { %v466_v43 = vpack.c.bf16 %v446_v39, %v444_v38  ;;  %v410_v49 = vld [vmem:[%s1255_s19 + $0x98] sm:$0xff]  ;;  %v440_v52 = vadd.f32 %v408_v48, %v376_v46  ;;  %v373_v56 = vld [vmem:[%s1248_s18 + $0x70] sm:$0xff]  ;;  %v403_v58 = vld [vmem:[%s1255_s19 + $0x60] sm:$0xff]  ;;  %p919_p4 = pneg %p918_p3 }
  0x5a   : > { %v442_v53 = vadd.f32 %v410_v49, %v378_v47  ;;  %v463_v54 = vpack.c.bf16 %v441_v51, %v439_v50  ;;  %v405_v59 = vld [vmem:[%s1255_s19 + $0x70] sm:$0xff]  ;;  %v372_v60 = vld [vmem:[%s1248_s18 + $0x68] sm:$0xff]  ;;  %v374_v61 = vld [vmem:[%s1248_s18 + $0x78] sm:$0xff]  ;;  %v435_v0 = vadd.f32 %v403_v58, %v371_v55 }
  0x5b   : > { %v404_v62 = vld [vmem:[%s1255_s19 + $0x68] sm:$0xff]  ;;  %v406_v63 = vld [vmem:[%s1255_s19 + $0x78] sm:$0xff]  ;;  %v437_v1 = vadd.f32 %v405_v59, %v373_v56  ;;  %v367_v5 = vld [vmem:[%s1248_s18 + $0x40] sm:$0xff] }
  0x5c   : > { %480 = vmatpush.bf16.xpose.msra.mxu0 %v467_v26  ;;  %v464_v57 = vpack.c.bf16 %v442_v53, %v440_v52  ;;  %v436_v2 = vadd.f32 %v404_v62, %v372_v60  ;;  %v438_v3 = vadd.f32 %v406_v63, %v374_v61  ;;  %v369_v6 = vld [vmem:[%s1248_s18 + $0x50] sm:$0xff]  ;;  %v399_v8 = vld [vmem:[%s1255_s19 + $0x40] sm:$0xff]  ;;  %v368_v10 = vld [vmem:[%s1248_s18 + $0x48] sm:$0xff] }
  0x5d   : > { %v461_v4 = vpack.c.bf16 %v437_v1, %v435_v0  ;;  %v401_v9 = vld [vmem:[%s1255_s19 + $0x50] sm:$0xff]  ;;  %v370_v11 = vld [vmem:[%s1248_s18 + $0x58] sm:$0xff]  ;;  %v400_v12 = vld [vmem:[%s1255_s19 + $0x48] sm:$0xff]  ;;  %v431_v14 = vadd.f32 %v399_v8, %v367_v5 }
  0x5e   : > { %494 = vmatpush.bf16.xpose.msra.mxu1 %v468_v29  ;;  %v462_v7 = vpack.c.bf16 %v438_v3, %v436_v2  ;;  %v402_v13 = vld [vmem:[%s1255_s19 + $0x58] sm:$0xff]  ;;  %v433_v15 = vadd.f32 %v401_v9, %v369_v6  ;;  %v432_v16 = vadd.f32 %v400_v12, %v368_v10  ;;  %v363_v19 = vld [vmem:[%s1248_s18 + $0x20] sm:$0xff]  ;;  %v365_v20 = vld [vmem:[%s1248_s18 + $0x30] sm:$0xff] }
  0x5f   : > { %v434_v17 = vadd.f32 %v402_v13, %v370_v11  ;;  %v395_v22 = vld [vmem:[%s1255_s19 + $0x20] sm:$0xff]  ;;  %v397_v23 = vld [vmem:[%s1255_s19 + $0x30] sm:$0xff]  ;;  %v364_v24 = vld [vmem:[%s1248_s18 + $0x28] sm:$0xff] }
  0x60   : > { %v459_v18 = vpack.c.bf16 %v433_v15, %v431_v14  ;;  %v366_v25 = vld [vmem:[%s1248_s18 + $0x38] sm:$0xff]  ;;  %v396_v26 = vld [vmem:[%s1255_s19 + $0x28] sm:$0xff]  ;;  %v427_v28 = vadd.f32 %v395_v22, %v363_v19  ;;  %v429_v29 = vadd.f32 %v397_v23, %v365_v20  ;;  %v359_v33 = vld [vmem:[%s1248_s18] sm:$0xff] }
  0x61   : > { %v460_v21 = vpack.c.bf16 %v434_v17, %v432_v16  ;;  %v398_v27 = vld [vmem:[%s1255_s19 + $0x38] sm:$0xff]  ;;  %v428_v30 = vadd.f32 %v396_v26, %v364_v24  ;;  %v361_v34 = vld [vmem:[%s1248_s18 + $0x10] sm:$0xff]  ;;  %v391_v36 = vld [vmem:[%s1255_s19] sm:$0xff] }
  0x62   : > { %v430_v31 = vadd.f32 %v398_v27, %v366_v25  ;;  %v457_v32 = vpack.c.bf16 %v429_v29, %v427_v28  ;;  %v393_v37 = vld [vmem:[%s1255_s19 + $0x10] sm:$0xff]  ;;  %v360_v38 = vld [vmem:[%s1248_s18 + $0x8] sm:$0xff]  ;;  %v362_v39 = vld [vmem:[%s1248_s18 + $0x18] sm:$0xff]  ;;  %v423_v42 = vadd.f32 %v391_v36, %v359_v33  ;;  %s920_s18 = scalar_lea.hbm %s1382_s5, 48 }
  0x63   : > { %v394_v41 = vld [vmem:[%s1255_s19 + $0x18] sm:$0xff]  ;;  %v473_v48 = vld [vmem:[#allocation5] sm:$0xff]  ;;  %v475_v49 = vld [vmem:[#allocation5 + $0x10] sm:$0xff]  ;;  %p922_p8 = scmp.lt.s32.totalorder %s920_s18, %s916_s26 }
  0x64   : > { %481 = vmatpush.bf16.xpose.msra.mxu0 %v465_v40  ;;  %v458_v35 = vpack.c.bf16 %v430_v31, %v428_v30  ;;  %v392_v40 = vld [vmem:[%s1255_s19 + $0x8] sm:$0xff]  ;;  %v426_v45 = vadd.f32 %v394_v41, %v362_v39  ;;  %v476_v51 = vld [vmem:[#allocation5 + $0x18] sm:$0xff]  ;;  %v477_v52 = vpack.c.bf16 %v475_v49, %v473_v48  ;;  %v809_v55 = vld [vmem:[%s347_s17] ss:$0 sm:$0xff] }
  0x65   : > { %v424_v44 = vadd.f32 %v392_v40, %v360_v38  ;;  %v474_v50 = vld [vmem:[#allocation5 + $0x8] sm:$0xff]  ;;  %p923_p11 = por %p922_p8, %p921_p9 }
  0x66   : > { %495 = vmatpush.bf16.xpose.msra.mxu1 %v466_v43  ;;  %v425_v43 = vadd.f32 %v393_v37, %v361_v34  ;;  %v478_v53 = vpack.c.bf16 %v476_v51, %v474_v50 }
  0x67   : > { %v456_v47 = vpack.c.bf16 %v426_v45, %v424_v44  ;;  %p924_p1 = pnand %p923_p11, %p919_p4 }
  0x68   : > { %v455_v46 = vpack.c.bf16 %v425_v43, %v423_v42 }
  0x6c   : > { %482 = vmatpush.bf16.xpose.msra.mxu0 %v463_v54 }
  0x6e   : > { %496 = vmatpush.bf16.xpose.msra.mxu1 %v464_v57 }
  0x74   : > { %483 = vmatpush.bf16.xpose.msra.mxu0 %v461_v4 }
  0x76   : > { %497 = vmatpush.bf16.xpose.msra.mxu1 %v462_v7 }
  0x7c   : > { %484 = vmatpush.bf16.xpose.msra.mxu0 %v459_v18 }
  0x7e   : > { %498 = vmatpush.bf16.xpose.msra.mxu1 %v460_v21 }
  0x84   : > { %485 = vmatpush.bf16.xpose.msra.mxu0 %v457_v32 }
  0x86   : > { %499 = vmatpush.bf16.xpose.msra.mxu1 %v458_v35 }
  0x8c   : > { %486 = vmatpush.bf16.xpose.msra.mxu0 %v455_v46 }
  0x8e   : > { %500 = vmatpush.bf16.xpose.msra.mxu1 %v456_v47 }
  0x93   : > { %487 = vmatmul.bf16.vlgmr.msra.gmra.mxu0 %v477_v52 }
  0x95   : > { %501 = vmatmul.bf16.vlgmr.msra.gmra.mxu1 %v478_v53 }
 0x110   : > { %v488_v54 = vpop.f32.mrf.mxu0 }
 0x112   : > { %v502_v56 = vpop.f32.mrf.mxu1 }
 0x113   : > { %v503_v57 = vadd.f32 %v502_v56, %v488_v54 }
 0x115   : > { %v507_v58 = vadd.f32 %v809_v55, %v503_v57 }
 0x117   : > { %516 = vst [vmem:[%s337_s25] sm:$0xff] %v507_v58 }
 0x118   : > { %v490_v59 = vpop.f32.mrf.mxu0 }
 0x11a   : > { %v504_v60 = vpop.f32.mrf.mxu1 }
 0x11b   : > { %v505_v61 = vadd.f32 %v504_v60, %v490_v59 }
 0x11d   : > { %v508_v62 = vadd.f32 %v809_v55, %v505_v61 }
 0x11f   : > { %517 = vst [vmem:[%s337_s25 + $0x8] sm:$0xff] %v508_v62 }
 0x120   : > { %927 = shalt.err (!%p924_p1)
}
 0x121   : > { %s1019_s15 = smov 128   ;;  %s1020_s19 = smov 384  }
 0x122   : > { %s1021_s14 = smov 8  }
 0x123   : > { %710 = dma.vmem_to_hbm [thread:$0]  (%p1182_p6), %s534_s29, 256, %s536_s10, %s519_s9, %s1019_s15, %s1020_s19, %s1021_s14  }
 0x124 PF: > { %s1411_s6 = sld [smem:[#allocation16_spill]]  ;;  %p730_p12 = scmp.ge.s32.totalorder %s1014_s27, 2 }
 0x126   : > { %p724_p13 = pnand %p730_p12, %p1135_p7 }
 0x128   : > { %p725_p2 = pneg %p724_p13 }
 0x12a   : > { %s550_s17 = sand.u32 1, %s1411_s6  }
 0x12b   : > { %s551_s28 = scalar_lea.sflag [#allocation7], %s550_s17 }
 0x12c   : > { %977 = dma.done.wait (%p725_p2), %s551_s28, 256  }
 0x12d   : > { %979 = vsyncadd (%p725_p2), %s551_s28, 4294967040  ;;  %s23_s27 = sadd.s32 1, %s1014_s27   ;;  %s1413_s30 = sld [smem:[#allocation21_spill]] }
 0x12e   : > { %p20_p5 = scmp.ge.s32.totalorder %s23_s27, 5   ;;  %s1414_s1 = sld [smem:[#allocation17_spill]] }
 0x12f   : > { %s1415_s25 = sld [smem:[#allocation19_spill]]  ;;  %s1417_s20 = smov %s986_s21 }
 0x130   : > { %s1416_s8 = sld [smem:[#allocation18_spill]]  ;;  %s1418_s21 = smov %s990_s22 }
 0x131   : > { %s1420_s23 = smov %s998_s24  ;;  %s1422_s26 = smov %s1010_s0 }
 0x132   :  { %22 = sbr.rel (!%p20_p5) target bundleno = 13 (0xd), region = 109 }
 0x133   : > { %s1419_s22 = smov %s1413_s30 }
 0x134   : > { %s1421_s24 = smov %s1414_s1 }
 0x136   : > { %s1423_s0 = smov %s1416_s8 }
 0x137   :  { %557 = vsyncpa [#allocation6], 1 }
 0x138   :  { %559 = vsyncpa [#allocation6 + $0x1], 1 }
 0x139   :  { %560 = vsyncpa [#allocation9], 1 }
 0x13a   :  { %562 = vsyncpa [#allocation9 + $0x1], 1 }
 0x13b   :  { %563 = vsyncpa [#allocation7], 1 }
 0x13c   :  { %565 = vsyncpa [#allocation7 + $0x1], 1 }

</bundles_post_ra>
